<compile_context>
chip_gen: v7x
topology: tpu7x:2x2x1
jax: 0.10.0
libtpu: 0.0.40
codegen_flags: <defaults>
</compile_context>

<pallas_src>
import functools
import numpy as np

import jax
import jax.numpy as jnp
from jax.experimental import pallas as pl
from jax.experimental.pallas import tpu as pltpu

COMPUTE_DTYPE = jnp.bfloat16   # activation / matmul-input storage dtype
_EPS = 1e-5
_VMEM_LIMIT = 64 * 1024 * 1024


# ---------------------------------------------------------------------------
# small helpers
# ---------------------------------------------------------------------------

def _compiler_params(dimension_semantics):
    return pltpu.CompilerParams(dimension_semantics=dimension_semantics,
                                vmem_limit_bytes=_VMEM_LIMIT)


def _pick_tile(m, max_tile=512):
    """Largest row tile <= max_tile, multiple of 8, dividing (padded) m.

    The tile is additionally capped at ~m/2 so there are >= 2 grid steps
    (v7x megacore: a grid of 1 cannot be sharded across the two TensorCores).
    """
    def _search(total):
        cap = min(max_tile, total)
        if total >= 16:
            half = (total // 2) - ((total // 2) % 8)
            cap = min(cap, max(8, half))
        cap -= cap % 8
        cap = max(cap, 8)
        for t in range(cap, 7, -8):
            if total % t == 0:
                return t
        return None

    t = _search(m)
    if t is not None:
        return t, m
    mp = ((m + 7) // 8) * 8
    t = _search(mp)
    return (t if t is not None else 8), mp


def _pad_rows(a, mp):
    m = a.shape[0]
    return a if mp == m else jnp.pad(a, ((0, mp - m), (0, 0)))


def _approx_reciprocal(x):
    if hasattr(pl, "reciprocal"):
        return pl.reciprocal(x, approx=True)
    return 1.0 / x


# ---------------------------------------------------------------------------
# Pallas kernels
# ---------------------------------------------------------------------------

def _matmul_bias_kernel(x_ref, w_ref, b_ref, o_ref, *, activation):
    acc = jnp.dot(x_ref[...], w_ref[...], preferred_element_type=jnp.float32)
    acc = acc + b_ref[...]
    if activation == "relu":
        acc = jnp.maximum(acc, 0.0)
    elif activation == "gelu":
        acc = jax.nn.gelu(acc, approximate=True)
    o_ref[...] = acc.astype(o_ref.dtype)


def matmul_bias(x, w, b, activation=None, max_tile=512):
    """x:(M,K) @ w:(K,N) + b with optional fused activation."""
    m, k = x.shape
    n = w.shape[1]
    tile, mp = _pick_tile(m, max_tile)
    xb = _pad_rows(x.astype(COMPUTE_DTYPE), mp)
    out = pl.pallas_call(
        functools.partial(_matmul_bias_kernel, activation=activation),
        out_shape=jax.ShapeDtypeStruct((mp, n), COMPUTE_DTYPE),
        grid=(mp // tile,),
        in_specs=[
            pl.BlockSpec((tile, k), lambda i: (i, 0)),
            pl.BlockSpec((k, n), lambda i: (0, 0)),
            pl.BlockSpec((1, n), lambda i: (0, 0)),
        ],
        out_specs=pl.BlockSpec((tile, n), lambda i: (i, 0)),
        compiler_params=_compiler_params(("parallel",)),
    )(xb, w.astype(COMPUTE_DTYPE), b.reshape(1, n).astype(jnp.float32))
    return out[:m]


def _block_core_kernel(x_ref, h_ref, g_ref, bt_ref, wm_ref, bm_ref, wb_ref, bb_ref,
                       w1_ref, b1_ref, w2_ref, b2_ref, xn_ref, y0_ref, *, eps):
    """channel-norm -> FiLM (mul/bias computed in-kernel) -> FFN -> + residual."""
    x = x_ref[...].astype(jnp.float32)
    mu = jnp.mean(x, axis=-1, keepdims=True)
    var = jnp.mean(jnp.square(x - mu), axis=-1, keepdims=True)
    xhat = (x - mu) * jax.lax.rsqrt(var + eps)
    xhat = xhat * g_ref[...] + bt_ref[...]
    h = h_ref[...]                                           # (tile, 4C) ReLU'd hidden
    mul = jnp.dot(h, wm_ref[...], preferred_element_type=jnp.float32) + bm_ref[...]
    bias = jnp.dot(h, wb_ref[...], preferred_element_type=jnp.float32) + bb_ref[...]
    xn = xhat * mul + bias                                   # FiLM
    xn_ref[...] = xn.astype(xn_ref.dtype)
    hh = jnp.dot(xn.astype(w1_ref.dtype), w1_ref[...],
                 preferred_element_type=jnp.float32) + b1_ref[...]
    hh = jax.nn.gelu(hh, approximate=True).astype(w2_ref.dtype)
    f = jnp.dot(hh, w2_ref[...], preferred_element_type=jnp.float32) + b2_ref[...]
    y0_ref[...] = (f + x).astype(y0_ref.dtype)               # ffn(xn) + residual


def block_core(x2d, h_all, blk_idx, norm_p, film_p, ffn_p, eps=_EPS, max_tile=512):
    """h_all: (M, nb*4C) stage-shared FiLM hidden; this block's columns are selected
    purely via the BlockSpec index_map (no XLA slice, no in-kernel lane-offset slice)."""
    m, C = x2d.shape
    dh = ffn_p["w1"].shape[1]
    tile, mp = _pick_tile(m, max_tile)
    xb = _pad_rows(x2d.astype(COMPUTE_DTYPE), mp)
    hb = _pad_rows(h_all.astype(COMPUTE_DTYPE), mp)
    xn, y0 = pl.pallas_call(
        functools.partial(_block_core_kernel, eps=eps),
        out_shape=(jax.ShapeDtypeStruct((mp, C), COMPUTE_DTYPE),
                   jax.ShapeDtypeStruct((mp, C), COMPUTE_DTYPE)),
        grid=(mp // tile,),
        in_specs=[
            pl.BlockSpec((tile, C), lambda i: (i, 0)),
            pl.BlockSpec((tile, dh), lambda i, b=blk_idx: (i, b)),
            pl.BlockSpec((1, C), lambda i: (0, 0)),
            pl.BlockSpec((1, C), lambda i: (0, 0)),
            pl.BlockSpec((dh, C), lambda i: (0, 0)),
            pl.BlockSpec((1, C), lambda i: (0, 0)),
            pl.BlockSpec((dh, C), lambda i: (0, 0)),
            pl.BlockSpec((1, C), lambda i: (0, 0)),
            pl.BlockSpec((C, dh), lambda i: (0, 0)),
            pl.BlockSpec((1, dh), lambda i: (0, 0)),
            pl.BlockSpec((dh, C), lambda i: (0, 0)),
            pl.BlockSpec((1, C), lambda i: (0, 0)),
        ],
        out_specs=(pl.BlockSpec((tile, C), lambda i: (i, 0)),
                   pl.BlockSpec((tile, C), lambda i: (i, 0))),
        compiler_params=_compiler_params(("parallel",)),
    )(xb, hb,
      norm_p["gamma"].reshape(1, C).astype(jnp.float32),
      norm_p["beta"].reshape(1, C).astype(jnp.float32),
      film_p["w_mul"].astype(COMPUTE_DTYPE),
      film_p["b_mul"].reshape(1, C).astype(jnp.float32),
      film_p["w_bias"].astype(COMPUTE_DTYPE),
      film_p["b_bias"].reshape(1, C).astype(jnp.float32),
      ffn_p["w1"].astype(COMPUTE_DTYPE), ffn_p["b1"].reshape(1, dh).astype(jnp.float32),
      ffn_p["w2"].astype(COMPUTE_DTYPE), ffn_p["b2"].reshape(1, C).astype(jnp.float32))
    return xn[:m], y0[:m]


def _gconv_add_kernel(x_ref, w_ref, b_ref, y0_ref, o_ref, xs_ref,
                      *, H, W, groups, cg, pad_rows):
    """Grouped 3x3 conv (padding=1) on flattened image rows, fused with the running-sum
    add.  The 1-pixel halo is realised in a VMEM scratch + edge masks (no HBM pad), and
    the 9 taps are gathered into an in-VMEM im2col so each group is ONE MXU dot with
    K = 9*cg."""
    Mb = x_ref.shape[0]                         # n_img * H * W rows in this block
    xs_ref[...] = jnp.zeros_like(xs_ref)
    xs_ref[pad_rows:pad_rows + Mb, :] = x_ref[...]

    pos = jax.lax.broadcasted_iota(jnp.int32, (Mb, 1), 0)
    wpos = pos % W
    hpos = (pos // W) % H
    not_top = hpos != 0
    not_bottom = hpos != (H - 1)
    not_left = wpos != 0
    not_right = wpos != (W - 1)

    conv_groups = []
    for gi in range(groups):
        lo = gi * cg
        taps = []
        for t in range(9):
            oy = t // 3 - 1
            ox = t % 3 - 1
            start = pad_rows + oy * W + ox
            tap = xs_ref[start:start + Mb, lo:lo + cg]
            mask = None
            if oy == -1:
                mask = not_top
            elif oy == 1:
                mask = not_bottom
            if ox == -1:
                mask = not_left if mask is None else (mask & not_left)
            elif ox == 1:
                mask = not_right if mask is None else (mask & not_right)
            if mask is not None:
                tap = jnp.where(mask, tap, 0)
            taps.append(tap)
        col = jnp.concatenate(taps, axis=-1)                      # (Mb, 9*cg) bf16
        conv_groups.append(jnp.dot(col, w_ref[gi],
                                   preferred_element_type=jnp.float32))
    conv = conv_groups[0] if groups == 1 else jnp.concatenate(conv_groups, axis=-1)
    o_ref[...] = (conv + b_ref[...] + y0_ref[...].astype(jnp.float32)).astype(o_ref.dtype)


def _pick_images_per_step(B, m_img):
    for k in range(1, B + 1):
        if B % k == 0 and (k * m_img) % 8 == 0 and (B // k >= 2 or k == B):
            return k
    return B   # full-array block (always a legal block shape)


def gconv3x3_add(xn2d, y0_2d, w, b, B, H, W, C):
    """conv3x3(groups)(xn) + y0, both in flattened (B*H*W, C) layout."""
    m_img = H * W
    groups, k9, cg = w.shape
    n_img = _pick_images_per_step(B, m_img)
    rows = n_img * m_img
    pad_rows = ((W + 1 + 7) // 8) * 8            # >= W+1, multiple of 8
    out = pl.pallas_call(
        functools.partial(_gconv_add_kernel, H=H, W=W, groups=groups, cg=cg,
                          pad_rows=pad_rows),
        out_shape=jax.ShapeDtypeStruct((B * m_img, C), COMPUTE_DTYPE),
        grid=(B // n_img,),
        in_specs=[
            pl.BlockSpec((rows, C), lambda r: (r, 0)),
            pl.BlockSpec((groups, k9, cg), lambda r: (0, 0, 0)),
            pl.BlockSpec((1, C), lambda r: (0, 0)),
            pl.BlockSpec((rows, C), lambda r: (r, 0)),
        ],
        out_specs=pl.BlockSpec((rows, C), lambda r: (r, 0)),
        scratch_shapes=[pltpu.VMEM((rows + 2 * pad_rows, C), COMPUTE_DTYPE)],
        compiler_params=_compiler_params(("parallel",)),
    )(xn2d.astype(COMPUTE_DTYPE), w.astype(COMPUTE_DTYPE),
      b.reshape(1, C).astype(jnp.float32), y0_2d.astype(COMPUTE_DTYPE))
    return out


def _fused_window_attn_kernel(x_ref, qw_ref, qb_ref, kw_ref, kb_ref, vw_ref, vb_ref,
                              pw_ref, pb_ref, o_ref, *, n_heads, hd, scale):
    """Per-window QKV projection + multi-head softmax attention + output projection."""
    x = x_ref[...]                                         # (gb, L, C) bf16
    gb, L, C = x.shape

    def project(w_ref, b_ref):
        w = jnp.broadcast_to(w_ref[...], (gb, C, C))
        y = jax.lax.dot_general(x, w, (((2,), (1,)), ((0,), (0,))),
                                preferred_element_type=jnp.float32)
        return y + b_ref[...]

    q = project(qw_ref, qb_ref) * scale
    k = project(kw_ref, kb_ref)
    v = project(vw_ref, vb_ref)

    heads = []
    for h in range(n_heads):
        sl = slice(h * hd, (h + 1) * hd)
        qh = q[:, :, sl].astype(COMPUTE_DTYPE)
        kh = k[:, :, sl].astype(COMPUTE_DTYPE)
        vh = v[:, :, sl].astype(COMPUTE_DTYPE)
        s = jax.lax.dot_general(qh, kh, (((2,), (2,)), ((0,), (0,))),
                                preferred_element_type=jnp.float32)      # (gb, L, L)
        m = jnp.max(s, axis=-1, keepdims=True)
        p = jnp.exp(s - m)
        p = p * _approx_reciprocal(jnp.sum(p, axis=-1, keepdims=True))
        o = jax.lax.dot_general(p.astype(COMPUTE_DTYPE), vh,
                                (((2,), (1,)), ((0,), (0,))),
                                preferred_element_type=jnp.float32)      # (gb, L, hd)
        heads.append(o)
    att = heads[0] if n_heads == 1 else jnp.concatenate(heads, axis=-1)   # (gb, L, C)

    pw = jnp.broadcast_to(pw_ref[...], (gb, C, C))
    out = jax.lax.dot_general(att.astype(COMPUTE_DTYPE), pw,
                              (((2,), (1,)), ((0,), (0,))),
                              preferred_element_type=jnp.float32) + pb_ref[...]
    o_ref[...] = out.astype(o_ref.dtype)


def _pick_group_batch(G, max_gb=16):
    best = 1
    for gb in range(1, min(G, max_gb) + 1):
        if G % gb == 0 and (G // gb >= 2 or gb == G):
            best = gb
    return best


def window_attention_fused(ap, xn, n_heads, window_size, shift):
    # TODO(synk): shifted-window attention mask from the original WindowAttention
    # (source unavailable) is not applied; cyclic shift without boundary mask.
    B, H, W, C = xn.shape
    ws = window_size
    assert H % ws == 0 and W % ws == 0, "H/W must be multiples of window_size"
    hd = C // n_heads
    x_s = jnp.roll(xn, shift=(-shift, -shift), axis=(1, 2)) if shift else xn
    nh_, nw_ = H // ws, W // ws
    L = ws * ws
    G = B * nh_ * nw_
    x_win = x_s.reshape(B, nh_, ws, nw_, ws, C).transpose(0, 1, 3, 2, 4, 5) \
               .reshape(G, L, C)
    gb = _pick_group_batch(G)
    out = pl.pallas_call(
        functools.partial(_fused_window_attn_kernel, n_heads=n_heads, hd=hd,
                          scale=float(1.0 / np.sqrt(hd))),
        out_shape=jax.ShapeDtypeStruct((G, L, C), COMPUTE_DTYPE),
        grid=(G // gb,),
        in_specs=[pl.BlockSpec((gb, L, C), lambda g: (g, 0, 0)),
                  pl.BlockSpec((C, C), lambda g: (0, 0)),
                  pl.BlockSpec((1, C), lambda g: (0, 0)),
                  pl.BlockSpec((C, C), lambda g: (0, 0)),
                  pl.BlockSpec((1, C), lambda g: (0, 0)),
                  pl.BlockSpec((C, C), lambda g: (0, 0)),
                  pl.BlockSpec((1, C), lambda g: (0, 0)),
                  pl.BlockSpec((C, C), lambda g: (0, 0)),
                  pl.BlockSpec((1, C), lambda g: (0, 0))],
        out_specs=pl.BlockSpec((gb, L, C), lambda g: (g, 0, 0)),
        compiler_params=_compiler_params(("parallel",)),
    )(x_win.astype(COMPUTE_DTYPE),
      ap["q_w"].astype(COMPUTE_DTYPE), ap["q_b"].reshape(1, C).astype(jnp.float32),
      ap["k_w"].astype(COMPUTE_DTYPE), ap["k_b"].reshape(1, C).astype(jnp.float32),
      ap["v_w"].astype(COMPUTE_DTYPE), ap["v_b"].reshape(1, C).astype(jnp.float32),
      ap["proj_w"].astype(COMPUTE_DTYPE), ap["proj_b"].reshape(1, C).astype(jnp.float32))
    o = out.reshape(B, nh_, nw_, ws, ws, C).transpose(0, 1, 3, 2, 4, 5) \
           .reshape(B, H, W, C)
    if shift:
        o = jnp.roll(o, shift=(shift, shift), axis=(1, 2))
    return o


# ---------------------------------------------------------------------------
# NHWC building blocks
# ---------------------------------------------------------------------------

def conv1x1(x, w, b, activation=None):
    B, H, W, Cin = x.shape
    y = matmul_bias(x.reshape(B * H * W, Cin), w, b, activation=activation)
    return y.reshape(B, H, W, w.shape[1])


def positional_encoding_2d(B, H, W, C):
    # TODO(synk): PositionalEncoding2d source unavailable; standard sinusoidal 2D used.
    c4 = max(C // 4, 1)
    y = jnp.arange(H, dtype=jnp.float32)[:, None]
    x = jnp.arange(W, dtype=jnp.float32)[:, None]
    div = jnp.exp(jnp.arange(c4, dtype=jnp.float32) * (-np.log(10000.0) / c4))
    pe_y = jnp.concatenate([jnp.sin(y * div), jnp.cos(y * div)], axis=-1)
    pe_x = jnp.concatenate([jnp.sin(x * div), jnp.cos(x * div)], axis=-1)
    pe = jnp.concatenate(
        [jnp.broadcast_to(pe_y[:, None, :], (H, W, C // 2)),
         jnp.broadcast_to(pe_x[None, :, :], (H, W, C // 2))], axis=-1)
    return jnp.broadcast_to(pe[None], (B, H, W, C))


def time_encoding_2d(t, H, W, C):
    # TODO(synk): TimeEncoding2d source unavailable; standard sinusoidal time embedding used.
    half = C // 2
    div = jnp.exp(jnp.arange(half, dtype=jnp.float32) * (-np.log(10000.0) / half))
    emb = t[:, None].astype(jnp.float32) * div[None, :]
    emb = jnp.concatenate([jnp.sin(emb), jnp.cos(emb)], axis=-1)
    return jnp.broadcast_to(emb[:, None, None, :], (t.shape[0], H, W, C))


def swin_block_apply(p, x, h_all, blk_idx, window_size):
    # Eval mode: stochastic depth is a training-only branch and is skipped.
    # TODO(synk): ChannelNorm source unavailable; per-pixel LayerNorm over channels used.
    # TODO(synk): RandomMoE source unavailable; deterministic single-expert 4x GELU FFN used.
    # TODO(synk): residual stream held in bf16 between kernels (small drift vs fp32 torch).
    B, H, W, C = x.shape
    x2d = x.reshape(-1, C)
    xn2d, y0 = block_core(x2d, h_all, blk_idx, p["norm"], p["film"], p["ffn"])
    y1 = gconv3x3_add(xn2d, y0, p["conv_w"], p["conv_b"], B, H, W, C)
    if p["attention"]:
        xn = xn2d.reshape(B, H, W, C)
        att = window_attention_fused(p["attn"], xn, p["n_heads"], window_size,
                                     p["shift"])
        y1 = y1 + att.reshape(-1, C)
    # TODO(synk): CrossAttention exists in the module but is never invoked when
    # condition is None (as in this forward); params omitted.
    return y1.reshape(B, H, W, C)


def swin_stack_apply(p, x, get_embs, window_size):
    B, H, W, C = x.shape
    embs2d = get_embs(B, H, W, C)
    # One batched matmul produces the ReLU'd FiLM hidden for every block of the stage.
    h_all = matmul_bias(embs2d, p["film_w1"], p["film_b1"], activation="relu")
    for bi, bp in enumerate(p["blocks"]):
        x = swin_block_apply(bp, x, h_all, bi, window_size)
    return x


def avg_pool2(x):
    B, H, W, C = x.shape
    return x.reshape(B, H // 2, 2, W // 2, 2, C).mean(axis=(2, 4))


def upsample2(x):
    return jnp.repeat(jnp.repeat(x, 2, axis=1), 2, axis=2)


def unet_apply(params, x_nchw, time):
    """Input/output are NCHW (PyTorch convention); compute runs in NHWC/bf16."""
    x = jnp.transpose(x_nchw, (0, 2, 3, 1)).astype(COMPUTE_DTYPE)
    emb_cache = {}

    def get_embs(B, H, W, C):
        key = (H, W, C)
        if key not in emb_cache:
            pe = positional_encoding_2d(B, H, W, C)
            te = time_encoding_2d(time, H, W, C)
            emb_cache[key] = jnp.concatenate([pe, te], axis=-1) \
                .reshape(B * H * W, 2 * C).astype(COMPUTE_DTYPE)
        return emb_cache[key]

    # encoder_first: 1x1 stride-1 conv (stem_size == 1)
    x = conv1x1(x, params["enc_first_w"], params["enc_first_b"])
    skips = []
    n_stages = len(params["encoder"])
    for i, st in enumerate(params["encoder"]):
        x = swin_stack_apply(st["stage"], x, get_embs, st["window_size"])
        skips.insert(0, 0.0 if i == n_stages - 1 else x)
        if st["ch_conv"] is not None:
            # pool BEFORE the pointwise conv (commutes exactly; 4x fewer conv FLOPs)
            x = avg_pool2(x)
            x = conv1x1(x, st["ch_conv"]["w"], st["ch_conv"]["b"])
    for st, s in zip(params["decoder"], skips):
        if st["ch_conv"] is not None:
            # pointwise conv BEFORE nearest upsample (commutes exactly)
            x = conv1x1(x, st["ch_conv"]["w"], st["ch_conv"]["b"])
            x = upsample2(x)
        x = swin_stack_apply(st["stage"], x + s, get_embs, st["window_size"])
    # decoder_last: ConvTranspose2d with k=s=1 reduces to a pointwise matmul
    x = conv1x1(x, params["dec_last_w"], params["dec_last_b"])
    return jnp.transpose(x, (0, 3, 1, 2)).astype(jnp.float32)


# ---------------------------------------------------------------------------
# Deterministic parameter init
# ---------------------------------------------------------------------------

def _dense(key, cin, cout):
    kw, kb = jax.random.split(key)
    w = (jax.random.normal(kw, (cin, cout), jnp.float32) / np.sqrt(cin)).astype(COMPUTE_DTYPE)
    b = jax.random.normal(kb, (cout,), jnp.float32) * 0.01
    return w, b


def init_swin_block(key, C, head_dim, window_size, shift, attention):
    keys = jax.random.split(key, 10)
    n_heads = C // head_dim
    groups = n_heads
    cg = C // groups
    p = {"attention": attention, "n_heads": n_heads, "shift": shift}
    p["norm"] = {"gamma": jnp.ones((C,), jnp.float32),
                 "beta": jnp.zeros((C,), jnp.float32)}
    # FiLM MLP: first matmul weights are returned so the stack can batch them,
    # second matmul is pre-split into mul / bias halves (aligned, no lane slicing).
    w1, b1 = _dense(keys[0], 2 * C, 4 * C)
    wm, bm = _dense(keys[1], 4 * C, C)
    wb, bb = _dense(keys[2], 4 * C, C)
    p["film"] = {"w_mul": wm, "b_mul": bm, "w_bias": wb, "b_bias": bb}
    fw1, fb1 = _dense(keys[3], C, 4 * C)
    fw2, fb2 = _dense(keys[4], 4 * C, C)
    p["ffn"] = {"w1": fw1, "b1": fb1, "w2": fw2, "b2": fb2}
    # grouped 3x3 conv weight laid out as (groups, 9*cg, cg) for the im2col dot
    p["conv_w"] = (jax.random.normal(keys[5], (groups, 9 * cg, cg), jnp.float32)
                   / np.sqrt(9 * cg)).astype(COMPUTE_DTYPE)
    p["conv_b"] = jnp.zeros((C,), jnp.float32)
    if attention:
        qw, qb = _dense(keys[6], C, C)
        kw, kb_ = _dense(keys[7], C, C)
        vw, vb = _dense(keys[8], C, C)
        pw, pb = _dense(keys[9], C, C)
        p["attn"] = {"q_w": qw, "q_b": qb, "k_w": kw, "k_b": kb_,
                     "v_w": vw, "v_b": vb, "proj_w": pw, "proj_b": pb}
    return p, (w1, b1)


def init_swin_stack(key, C, head_dim, window_size, num_blocks, attention):
    keys = jax.random.split(key, num_blocks)
    blocks, w1s, b1s = [], [], []
    for i in range(num_blocks):
        shift = window_size // 2 if i % 2 == 0 else 0
        flag_attn = attention if i >= num_blocks - 2 else False
        bp, (w1, b1) = init_swin_block(keys[i], C, head_dim, window_size, shift, flag_attn)
        blocks.append(bp)
        w1s.append(w1)
        b1s.append(b1)
    return {"blocks": blocks,
            "film_w1": jnp.concatenate(w1s, axis=1),     # (2C, nb*4C)
            "film_b1": jnp.concatenate(b1s, axis=0)}     # (nb*4C,)


def init_unet(key, input_channels, stages, channels, head_dim, window_size):
    keys = jax.random.split(key, 2 + 4 * len(stages))
    params = {}
    params["enc_first_w"], params["enc_first_b"] = _dense(keys[0], input_channels, channels[0])
    params["dec_last_w"], params["dec_last_b"] = _dense(keys[1], channels[0], input_channels)
    encoder, decoder = [], []
    ki = 2
    for i, (l, c) in enumerate(zip(stages, channels)):
        enc_stage = init_swin_stack(keys[ki], c, head_dim, window_size, l, False); ki += 1
        dec_stage = init_swin_stack(keys[ki], c, head_dim, window_size, l, True); ki += 1
        if i == len(stages) - 1:
            enc_ch = dec_ch = None
        else:
            ew, eb = _dense(keys[ki], channels[i], channels[i + 1]); ki += 1
            dw, db = _dense(keys[ki], channels[i + 1], channels[i]); ki += 1
            enc_ch = {"w": ew, "b": eb}
            dec_ch = {"w": dw, "b": db}
        encoder.append({"stage": enc_stage, "ch_conv": enc_ch, "window_size": window_size})
        decoder.insert(0, {"stage": dec_stage, "ch_conv": dec_ch, "window_size": window_size})
    params["encoder"] = encoder
    params["decoder"] = decoder
    return params


# ---------------------------------------------------------------------------

if __name__ == "__main__":
    key = jax.random.PRNGKey(0)
    k_params, k_x, k_t = jax.random.split(key, 3)

    # Small config consistent with the module (stem_size=1, head_dim=32, window_size=6).
    input_channels = 4
    stages = [1, 1]
    channels = [32, 64]
    head_dim = 32
    window_size = 6
    B, H, W = 2, 12, 12

    params = init_unet(k_params, input_channels, stages, channels, head_dim, window_size)
    x = jax.random.normal(k_x, (B, input_channels, H, W), jnp.float32)
    t = jax.random.uniform(k_t, (B,), jnp.float32) * 100.0

    out = unet_apply(params, x, t)
    out = jax.block_until_ready(out)
    assert out.shape == (B, input_channels, H, W), out.shape
    assert bool(jnp.all(jnp.isfinite(out)))
    print("KERNEL_OK")
</pallas_src>

<mosaic_0001>
module attributes {stable_mosaic.version = 11 : i64} {
  func.func @_matmul_bias_kernel(%arg0: i32, %arg1: memref<144x4xbf16, #tpu.memory_space<vmem>>, %arg2: memref<4x32xbf16, #tpu.memory_space<vmem>>, %arg3: memref<1x32xf32, #tpu.memory_space<vmem>>, %arg4: memref<144x32xbf16, #tpu.memory_space<vmem>>) attributes {dimension_semantics = [#tpu.dimension_semantics<parallel>], iteration_bounds = array<i64: 2>, scalar_prefetch = 0 : i64, scratch_operands = 0 : i64, tpu.core_type = #tpu.core_type<tc>, window_params = [{transform_indices = @transform_0, window_bounds = array<i64: 144, 4>}, {pipeline_mode = #tpu.pipeline_mode<synchronous>, transform_indices = @transform_1, window_bounds = array<i64: 4, 32>}, {pipeline_mode = #tpu.pipeline_mode<synchronous>, transform_indices = @transform_2, window_bounds = array<i64: 1, 32>}, {transform_indices = @transform_3, window_bounds = array<i64: 144, 32>}]} {
    %c0 = arith.constant 0 : index
    %c0_0 = arith.constant 0 : index
    %0 = vector.load %arg1[%c0, %c0_0] : memref<144x4xbf16, #tpu.memory_space<vmem>>, vector<144x4xbf16>
    %c0_1 = arith.constant 0 : index
    %c0_2 = arith.constant 0 : index
    %1 = vector.load %arg2[%c0_1, %c0_2] : memref<4x32xbf16, #tpu.memory_space<vmem>>, vector<4x32xbf16>
    %cst = arith.constant dense<0.000000e+00> : vector<144x32xf32>
    %2 = tpu.matmul %0, %1, %cst {dimension_numbers = #tpu.dot_dimension_numbers<[1], [0], [0], [1], [0, 0, 1, 1], [], []>} : vector<144x4xbf16>, vector<4x32xbf16>, vector<144x32xf32> -> vector<144x32xf32>
    %c0_3 = arith.constant 0 : index
    %c0_4 = arith.constant 0 : index
    %3 = vector.load %arg3[%c0_3, %c0_4] : memref<1x32xf32, #tpu.memory_space<vmem>>, vector<1x32xf32>
    %4 = vector.broadcast %3 : vector<1x32xf32> to vector<144x32xf32>
    %5 = arith.addf %2, %4 : vector<144x32xf32>
    %6 = arith.truncf %5 : vector<144x32xf32> to vector<144x32xbf16>
    %c0_5 = arith.constant 0 : index
    %c0_6 = arith.constant 0 : index
    %7 = vector.load %arg4[%c0_5, %c0_6] : memref<144x32xbf16, #tpu.memory_space<vmem>>, vector<144x32xbf16>
    tpu.vector_store %arg4[%c0_5, %c0_6], %6 {strides = array<i32>} : memref<144x32xbf16, #tpu.memory_space<vmem>>, vector<144x32xbf16>,
    return
  }
  func.func @transform_0(%arg0: i32) -> (i32, i32) {
    %c0_i32 = arith.constant 0 : i32
    %c0_i32_0 = arith.constant 0 : i32
    return %arg0, %c0_i32 : i32, i32
  }
  func.func @transform_1(%arg0: i32) -> (i32, i32) {
    %c0_i32 = arith.constant 0 : i32
    %c0_i32_0 = arith.constant 0 : i32
    %c0_i32_1 = arith.constant 0 : i32
    return %c0_i32, %c0_i32_0 : i32, i32
  }
  func.func @transform_2(%arg0: i32) -> (i32, i32) {
    %c0_i32 = arith.constant 0 : i32
    %c0_i32_0 = arith.constant 0 : i32
    %c0_i32_1 = arith.constant 0 : i32
    return %c0_i32, %c0_i32_0 : i32, i32
  }
  func.func @transform_3(%arg0: i32) -> (i32, i32) {
    %c0_i32 = arith.constant 0 : i32
    %c0_i32_0 = arith.constant 0 : i32
    return %arg0, %c0_i32 : i32, i32
  }
}

</mosaic_0001>

<bundles_post_ra>
// kernel: tpu_custom_call.1
= control target key start
LH: loop header
LB: loop body
LE: loop exit
PB: predicated region body
PF: predicated region fallthrough
CT: control target
= control target key end

     0   :  { %8 = vsyncpa [#allocation3], 0  ;;  %s1337_s0 = inlined_call_operand.hbm [shape: bf16[288,4], index: 0, kind: input, shape index: {}]   ;;  %s1338_s1 = inlined_call_operand.hbm [shape: bf16[4,32], index: 1, kind: input, shape index: {}]   ;;  %s1339_s2 = inlined_call_operand.hbm [shape: f32[1,32], index: 2, kind: input, shape index: {}]   ;;  %s1340_s3 = inlined_call_operand.hbm [shape: bf16[288,32], index: 3, kind: output, shape index: {}]  }
   0x1   :  { %10 = vsyncpa [#allocation3 + $0x1], 0 }
   0x2   :  { %11 = vsyncpa [#allocation6], 0 }
   0x3   :  { %12 = vsyncpa [#allocation4], 0 }
   0x4   :  { %14 = vsyncpa [#allocation4 + $0x1], 0  ;;  %s1013_s12 = smov 0   ;;  %s1015_s13 = smov 0  }
   0x5   :  { %s1017_s14 = smov 0   ;;  %s1019_s15 = smov 0  }
   0x6 LB: > { %s1034_s16 = sadd.s32 4294967295, %s981_s15   ;;  %s622_s17 = sadd.s32 4294967294, %s981_s15   ;;  %s981_s15 = sphi %s1019_s15, %s1365_s15   ;;  %s977_s14 = sphi %s1017_s14, %s1364_s14   ;;  %s973_s13 = sphi %s1015_s13, %s1363_s13   ;;  %s969_s12 = sphi %s1013_s12, %s1362_s12  }
   0x7   : > { %s1038_s18 = sadd.s32 1, %s981_s15   ;;  %s27_s19 = sadd.s32 1, %s977_s14 }
   0x8   : > { %s24_s20 = ssub.s32 %s981_s15, %s1038_s18  ;;  %p34_p0 = scmp.ne.s32.totalorder %s977_s14, %s973_s13 }
   0x9   : > { %p25_p1 = scmp.eq.s32.totalorder %s24_s20, 0  ;;  %p35_p2 = scmp.eq.s32.totalorder %s981_s15, 0 }
   0xa   : > { %p40_p3 = scmp.ne.s32.totalorder %s973_s13, %s969_s12  ;;  %p1341_p4 = scmp.eq.s32.totalorder %s1034_s16, 0 }
   0xb   : > { %s1050_s21 = scalar_select %p25_p1, %s977_s14, %s27_s19  }
   0xc   : > { %p1052_p5 = por %p35_p2, %p34_p0  ;;  %p1058_p6 = por %p1341_p4, %p40_p3 }
   0xd   : > { %p106_p7 = scmp.eq.s32.totalorder %s1034_s16, 1  ;;  %p112_p8 = scmp.eq.s32.totalorder %s622_s17, 1 }
   0xe   : > { %s1347_s23 = scalar_select %p1058_p6, 1, 0 }
   0xf   : > { %p623_p9 = scmp.ge.s32.totalorder %s981_s15, 1  ;;  %p119_p10 = scmp.lt.s32.totalorder %s981_s15, 3 }
  0x10   : > { %p1065_p11 = por %p106_p7, %p34_p0  ;;  %p1069_p12 = por %p112_p8, %p40_p3 }
  0x11   : > { %p1073_p13 = pnand %p623_p9, %p119_p10  ;;  %s983_s27 = smov [#allocation5]  }
  0x12   : > { %s1348_s24 = scalar_select %p1065_p11, 1, 0 }
  0x13   : > { %s1349_s25 = scalar_select %p1069_p12, 1, 0 }
  0x14   : > { %s1350_s26 = scalar_select %p1073_p13, 1, 0 }
  0x15   : > { %p755_p2 = pneg %p1073_p13  ;;  %s132_s28 = sshll.u32 %s983_s27, 4  ;;  %s133_s28 = int_to_ptr.vmem [resolvable:$true] %s132_s28 }
  0x16   : > { %p772_p4 = scmp.lt.s32.totalorder %s981_s15, 2  ;;  %p1351_p0 = scmp.eq.s32.totalorder %s1034_s16, 0 }
  0x17   : > { %s984_s4 = smov [#allocation7]   ;;  %s825_s8 = scalar_lea.hbm %s1338_s1, 32 }
  0x18   : > { %p1083_p7 = pnand %p755_p2, %p1351_p0  ;;  %p1089_p3 = pnand %p772_p4, %p1052_p5 }
  0x19   : > { %s143_s5 = sshll.u32 %s984_s4, 4  ;;  %p826_p8 = scmp.ne.s32.totalorder %s1338_s1, %s825_s8  ;;  %s1093_s5 = int_to_ptr.vmem [resolvable:$true] %s143_s5 }
  0x1a   : > { %s1353_s30 = scalar_select %p1089_p3, 1, 0 }
  0x1b   : > { %p827_p9 = pneg %p1083_p7  ;;  %p832_p10 = scmp.lt.u32.totalorder %s825_s8, %s1338_s1 }
  0x1d   : > { %p828_p4 = pnand %p827_p9, %p826_p8 }
  0x1f   : > { %p829_p5 = pneg %p828_p4 }
  0x21   : > { %p834_p2 = pnand %p832_p10, %p829_p5 }
  0x23   : > { %837 = shalt.err (!%p834_p2)
}
  0x24   : > { %s838_s19 = scalar_lea.vmem %s133_s28, 32  ;;  %p846_p11 = scmp.lt.s32.totalorder %s133_s28, %s133_s28 }
  0x25   : > { %p839_p0 = scmp.ne.s32.totalorder %s133_s28, %s838_s19  ;;  %p847_p6 = scmp.lt.s32.totalorder %s838_s19, %s838_s19 }
  0x27   : > { %p841_p1 = pnand %p839_p0, %p827_p9  ;;  %p848_p13 = por %p847_p6, %p846_p11 }
  0x29   : > { %p842_p12 = pneg %p841_p1 }
  0x2b   : > { %p849_p3 = pnand %p848_p13, %p842_p12 }
  0x2d   : > { %852 = shalt.err (!%p849_p3)
}
  0x2e   : > { %758 = dma.hbm_to_vmem [thread:$0]  (!%p1083_p7), %s1338_s1, 32, %s133_s28, [#allocation6]  }
  0x2f   : > { %s154_s27 = sand.u32 1, %s977_s14   ;;  %s853_s7 = scalar_lea.hbm %s1339_s2, 16 }
  0x30   : > { %p854_p1 = scmp.ne.s32.totalorder %s1339_s2, %s853_s7  ;;  %p860_p12 = scmp.lt.u32.totalorder %s853_s7, %s1339_s2 }
  0x32   : > { %p856_p6 = pnand %p854_p1, %p827_p9 }
  0x34   : > { %p857_p11 = pneg %p856_p6 }
  0x36   : > { %p862_p13 = pnand %p860_p12, %p857_p11 }
  0x38   : > { %865 = shalt.err (!%p862_p13)
}
  0x39   : > { %s866_s28 = scalar_lea.vmem %s1093_s5, 16  ;;  %s873_s17 = scalar_lea.vmem %s1093_s5, 32 }
  0x3a   : > { %p867_p3 = scmp.ne.s32.totalorder %s1093_s5, %s866_s28  ;;  %p874_p5 = scmp.lt.s32.totalorder %s1093_s5, %s1093_s5 }
  0x3b   : > { %p875_p10 = scmp.lt.s32.totalorder %s873_s17, %s866_s28 }
  0x3c   : > { %p869_p8 = pnand %p867_p3, %p827_p9 }
  0x3d   : > { %p876_p2 = por %p875_p10, %p874_p5 }
  0x3e   : > { %p870_p4 = pneg %p869_p8 }
  0x40   : > { %p877_p0 = pnand %p876_p2, %p870_p4 }
  0x42   : > { %880 = shalt.err (!%p877_p0)
}
  0x43   : > { %761 = dma.hbm_to_vmem [thread:$0]  (!%p1083_p7), %s1339_s2, 16, %s1093_s5, [#allocation6]  }
  0x44   : > { %s741_s22 = smul.u32 72, %s154_s27  ;;  %s1152_s10 = scalar_lea.sflag [#allocation3], %s154_s27 }
  0x45   : > { %s671_s4 = smul.u32 1152, %s981_s15  ;;  %p1354_p7 = scmp.ne.s32.totalorder %s1353_s30, 0 }
  0x46   : > { %s158_s29 = scalar_lea.vmem [#allocation2], %s741_s22  ;;  %s886_s17 = scalar_lea.hbm %s1337_s0, 2304 }
  0x47   : > { %s1148_s8 = scalar_lea.hbm %s1337_s0, %s671_s4  ;;  %s165_s9 = sshll.u32 %s158_s29, 4  ;;  %s1150_s9 = int_to_ptr.vmem [resolvable:$true] %s165_s9 }
  0x48   : > { %s881_s11 = scalar_lea.hbm %s1148_s8, 1152  ;;  %p883_p1 = pneg %p1354_p7 }
  0x49   : > { %p882_p9 = scmp.ne.s32.totalorder %s1148_s8, %s881_s11  ;;  %p887_p12 = scmp.lt.u32.totalorder %s1148_s8, %s1337_s0 }
  0x4a   : > { %p888_p13 = scmp.lt.u32.totalorder %s886_s17, %s881_s11  ;;  %p890_p8 = scmp.lt.u32.totalorder %s881_s11, %s1148_s8 }
  0x4b   : > { %p884_p6 = pnand %p883_p1, %p882_p9 }
  0x4c   : > { %p889_p3 = por %p888_p13, %p887_p12 }
  0x4d   : > { %p885_p11 = pneg %p884_p6 }
  0x4e   : > { %p891_p4 = por %p890_p8, %p889_p3 }
  0x50   : > { %p892_p5 = pnand %p891_p4, %p885_p11 }
  0x52   : > { %895 = shalt.err (!%p892_p5)
}
  0x53   : > { %s896_s27 = scalar_lea.vmem %s1150_s9, 1152  ;;  %s985_s22 = smov [#allocation2]  }
  0x54   : > { %p897_p10 = scmp.ne.s32.totalorder %s1150_s9, %s896_s27  ;;  %s901_s4 = sshll.u32 %s985_s22, 4  ;;  %s902_s4 = int_to_ptr.vmem [resolvable:$false] %s901_s4 }
  0x55   : > { %s903_s6 = scalar_lea.vmem %s902_s4, 2304  ;;  %p904_p9 = scmp.lt.s32.totalorder %s1150_s9, %s902_s4 }
  0x56   : > { %p899_p2 = pnand %p897_p10, %p883_p1  ;;  %p905_p6 = scmp.lt.s32.totalorder %s903_s6, %s896_s27 }
  0x58   : > { %p900_p0 = pneg %p899_p2  ;;  %p906_p12 = por %p905_p6, %p904_p9 }
  0x5a   : > { %p907_p13 = pnand %p906_p12, %p900_p0 }
  0x5c   : > { %910 = shalt.err (!%p907_p13)
}
  0x5d   : > { %s986_s7 = smov 64   ;;  %s987_s29 = smov 4  }
  0x5e   : > { %765 = dma.hbm_to_vmem [thread:$0]  (!%p1354_p7), %s1148_s8, 1152, %s1150_s9, %s1152_s10, %s986_s7, %s986_s7, %s987_s29  }
  0x5f   : > { %p1355_p1 = scmp.ne.s32.totalorder %s1350_s26, 0 }
  0x60   : > { %s1183_s11 = sand.u32 (!%p1355_p1), 1, %s973_s13   ;;  %p1356_p11 = scmp.ne.s32.totalorder (!%p1355_p1), %s1347_s23, 0 }
  0x61   : > { %177 = sbr.rel (%p1355_p1) target bundleno = 379 (0x17b), region = 32  ;;  %s180_s28 = scalar_lea.sflag (!%p1355_p1), [#allocation3], %s1183_s11 }
  0x62   : > { %s742_s5 = smul.u32 (!%p1355_p1), 72, %s1183_s11 }
  0x64   : > { %s1189_s17 = scalar_lea.vmem (!%p1355_p1), [#allocation2], %s742_s5 }
  0x68   : > { %956 = dma.done.wait (%p1356_p11), %s180_s28, 1152  }
  0x69   : > { %958 = vsyncadd (%p1356_p11), %s180_s28, 4294966144  ;;  %p1357_p7 = scmp.eq.s32.totalorder %s1034_s16, 0 }
  0x6b   : > { %960 = dma.done.wait (%p1357_p7), [#allocation6], 48   ;;  %p1358_p3 = pmov %p1357_p7 }
  0x6c   : > { %v988_v0 = vmov 0.0   ;;  %vm989_vm0 = vmmov 0   ;;  %vm316_vm1 = vcmask 1041408   ;;  %v235_v1 = vld [vmem:[#allocation5] sm:$0x3]  ;;  %v816_v3 = vld [vmem:[%s1189_s17] sm:$0xff]  }
  0x6d   : > { %962 = vsyncadd (%p1358_p3), [#allocation6], 4294967248  ;;  %701 = vmatprep.subr.bf16.mxu0 %v988_v0  ;;  %703 = vmatprep.mubr.msk.bf16.mxu0 %vm989_vm0, %v988_v0  ;;  %v318_v2 = vsel %vm316_vm1, %v235_v1, 0  ;;  %vm288_vm2 = vcmask 31744   ;;  %v817_v4 = vld [vmem:[%s1189_s17 + $0x28] sm:$0xff]   ;;  %v819_v6 = vld [vmem:[%s1189_s17 + $0x30] sm:$0xff]  }
  0x6e   : > { %739 = vmatprep.subr.bf16.mxu1 %v988_v0  ;;  %723 = vmatprep.mubr.msk.bf16.mxu1 %vm989_vm0, %v988_v0  ;;  %v818_v5 = vld [vmem:[%s1189_s17 + $0x8] sm:$0xff]   ;;  %v820_v7 = vld [vmem:[%s1189_s17 + $0x10] sm:$0xff]   ;;  %v821_v8 = vld [vmem:[%s1189_s17 + $0x38] sm:$0xff]   ;;  %vm497_vm3 = vcmask 257024   ;;  %s1234_s23 = scalar_lea.vmem [#allocation8], %s742_s5  ;;  %s690_s26 = smul.u32 1152, %s1034_s16 }
  0x6f   : > { %702 = vmatpush3.bf16.msra.mxu0 %v318_v2  ;;  %740 = vmatpush3.bf16.msra.mxu1 %v318_v2  ;;  %v822_v9 = vld [vmem:[%s1189_s17 + $0x18] sm:$0xff]   ;;  %v823_v10 = vld [vmem:[%s1189_s17 + $0x40] sm:$0xff]   ;;  %v1226_v12 = vld [vmem:[#allocation7] ss:$0 sm:$0xff]  ;;  %s530_s30 = sshll.u32 %s1234_s23, 4  ;;  %s517_s16 = scalar_lea.sflag [#allocation4], %s1183_s11  ;;  %s1289_s30 = int_to_ptr.vmem [resolvable:$true] %s530_s30 }
  0x70   : > { %v824_v11 = vld [vmem:[%s1189_s17 + $0x20] sm:$0xff]   ;;  %s1287_s10 = scalar_lea.hbm %s1340_s3, %s690_s26  ;;  %s911_s19 = scalar_lea.vmem %s1289_s30, 1152 }
  0x71   : > { %p912_p8 = scmp.ne.s32.totalorder %s1289_s30, %s911_s19  ;;  %p1359_p4 = scmp.ne.s32.totalorder %s1348_s24, 0 }
  0x72   : > { %704 = vmatmul.mubr.msk.bf16.vlgmr.msra.gmra.mrb[0].mxu0 %vm288_vm2, %v816_v3  ;;  %724 = vmatmul.mubr.msk.bf16.vlgmr.msra.gmra.mrb[0].mxu1 %vm288_vm2, %v817_v4  ;;  %s990_s20 = smov [#allocation8]  }
  0x73   : > { %707 = vmatprep.mubr.msk.bf16.mxu0 %vm989_vm0, %v988_v0  ;;  %727 = vmatprep.mubr.msk.bf16.mxu1 %vm989_vm0, %v988_v0  ;;  %p913_p5 = pnand %p912_p8, %p1359_p4  ;;  %s915_s27 = sshll.u32 %s990_s20, 4  ;;  %s916_s27 = int_to_ptr.vmem [resolvable:$false] %s915_s27 }
  0x74   : > { %s917_s22 = scalar_lea.vmem %s916_s27, 2304  ;;  %p918_p2 = scmp.lt.s32.totalorder %s1289_s30, %s916_s27 }
  0x75   : > { %p914_p10 = pneg %p913_p5  ;;  %p919_p0 = scmp.lt.s32.totalorder %s917_s22, %s911_s19 }
  0x77   : > { %p920_p9 = por %p919_p0, %p918_p2 }
  0x79   : > { %p921_p6 = pnand %p920_p9, %p914_p10 }
  0x7a   : > { %708 = vmatmul.mubr.msk.bf16.gmra.mrb[4].mxu0 %vm288_vm2, %v818_v5  ;;  %728 = vmatmul.mubr.msk.bf16.gmra.mrb[4].mxu1 %vm288_vm2, %v819_v6 }
  0x7b   : > { %711 = vmatprep.mubr.msk.bf16.mxu0 %vm989_vm0, %v988_v0  ;;  %731 = vmatprep.mubr.msk.bf16.mxu1 %vm989_vm0, %v988_v0 }
  0x82   : > { %712 = vmatmul.mubr.msk.bf16.gmra.mrb[8].mxu0 %vm288_vm2, %v820_v7  ;;  %732 = vmatmul.mubr.msk.bf16.gmra.mrb[8].mxu1 %vm288_vm2, %v821_v8 }
  0x83   : > { %715 = vmatprep.mubr.msk.bf16.mxu0 %vm989_vm0, %v988_v0  ;;  %735 = vmatprep.mubr.msk.bf16.mxu1 %vm989_vm0, %v988_v0 }
  0x8a   : > { %716 = vmatmul.mubr.msk.bf16.gmra.mrb[12].mxu0 %vm288_vm2, %v822_v9  ;;  %736 = vmatmul.mubr.msk.bf16.gmra.mrb[12].mxu1 %vm288_vm2, %v823_v10 }
  0x8b   : > { %719 = vmatprep.mubr.msk.bf16.mxu0 %vm989_vm0, %v988_v0 }
  0x92   : > { %720 = vmatmul.mubr.msk.bf16.gmra.mrb[16].mxu0 %vm288_vm2, %v824_v11 }
 0x145   : > { %v354_v13 = vpop.f32.mrb[0].mxu0  ;;  %v394_v14 = vpop.f32.mrb[0].mxu1 }
 0x146   : > { %v355_v15 = vadd.f32 %v1226_v12, %v354_v13  ;;  %v705_v16 = vpop.f32.mrb[1].mxu0  ;;  %v395_v17 = vadd.f32 %v1226_v12, %v394_v14  ;;  %v725_v18 = vpop.f32.mrb[1].mxu1 }
 0x147   : > { %v357_v19 = vpop.f32.mrb[2].mxu0  ;;  %v397_v20 = vpop.f32.mrb[2].mxu1 }
 0x148   : > { %v672_v21 = vpack.c.bf16 %v355_v15, %v355_v15  ;;  %v358_v22 = vadd.f32 %v1226_v12, %v357_v19  ;;  %v706_v23 = vpop.f32.mrb[3].mxu0  ;;  %v682_v24 = vpack.c.bf16 %v395_v17, %v395_v17  ;;  %v398_v25 = vadd.f32 %v1226_v12, %v397_v20  ;;  %v726_v26 = vpop.f32.mrb[3].mxu1 }
 0x14a   : > { %498 = vst.msk [vmem:[%s1234_s23] sm:$0xf] %vm497_vm3, %v672_v21  ;;  %v673_v27 = vpack.c.bf16 %v358_v22, %v358_v22  ;;  %508 = vst.msk [vmem:[%s1234_s23 + $0x28] sm:$0xf] %vm497_vm3, %v682_v24  ;;  %v683_v28 = vpack.c.bf16 %v398_v25, %v398_v25 }
 0x14c   : > { %499 = vst.msk [vmem:[%s1234_s23 + $0x4] sm:$0xf] %vm497_vm3, %v673_v27  ;;  %509 = vst.msk [vmem:[%s1234_s23 + $0x2c] sm:$0xf] %vm497_vm3, %v683_v28 }
 0x14d   : > { %v362_v29 = vpop.f32.mrb[4].mxu0  ;;  %v402_v30 = vpop.f32.mrb[4].mxu1 }
 0x14e   : > { %v363_v31 = vadd.f32 %v1226_v12, %v362_v29  ;;  %v709_v32 = vpop.f32.mrb[5].mxu0  ;;  %v403_v33 = vadd.f32 %v1226_v12, %v402_v30  ;;  %v729_v34 = vpop.f32.mrb[5].mxu1 }
 0x14f   : > { %v365_v35 = vpop.f32.mrb[6].mxu0  ;;  %v405_v36 = vpop.f32.mrb[6].mxu1 }
 0x150   : > { %v674_v37 = vpack.c.bf16 %v363_v31, %v363_v31  ;;  %v366_v38 = vadd.f32 %v1226_v12, %v365_v35  ;;  %v710_v39 = vpop.f32.mrb[7].mxu0  ;;  %v684_v40 = vpack.c.bf16 %v403_v33, %v403_v33  ;;  %v406_v41 = vadd.f32 %v1226_v12, %v405_v36  ;;  %v730_v42 = vpop.f32.mrb[7].mxu1 }
 0x152   : > { %500 = vst.msk [vmem:[%s1234_s23 + $0x8] sm:$0xf] %vm497_vm3, %v674_v37  ;;  %v675_v43 = vpack.c.bf16 %v366_v38, %v366_v38  ;;  %510 = vst.msk [vmem:[%s1234_s23 + $0x30] sm:$0xf] %vm497_vm3, %v684_v40  ;;  %v685_v44 = vpack.c.bf16 %v406_v41, %v406_v41 }
 0x154   : > { %501 = vst.msk [vmem:[%s1234_s23 + $0xc] sm:$0xf] %vm497_vm3, %v675_v43  ;;  %511 = vst.msk [vmem:[%s1234_s23 + $0x34] sm:$0xf] %vm497_vm3, %v685_v44 }
 0x155   : > { %v370_v45 = vpop.f32.mrb[8].mxu0  ;;  %v410_v46 = vpop.f32.mrb[8].mxu1 }
 0x156   : > { %v371_v47 = vadd.f32 %v1226_v12, %v370_v45  ;;  %v713_v48 = vpop.f32.mrb[9].mxu0  ;;  %v411_v49 = vadd.f32 %v1226_v12, %v410_v46  ;;  %v733_v50 = vpop.f32.mrb[9].mxu1 }
 0x157   : > { %v373_v51 = vpop.f32.mrb[10].mxu0  ;;  %v413_v52 = vpop.f32.mrb[10].mxu1 }
 0x158   : > { %v676_v53 = vpack.c.bf16 %v371_v47, %v371_v47  ;;  %v374_v54 = vadd.f32 %v1226_v12, %v373_v51  ;;  %v714_v55 = vpop.f32.mrb[11].mxu0  ;;  %v686_v56 = vpack.c.bf16 %v411_v49, %v411_v49  ;;  %v414_v57 = vadd.f32 %v1226_v12, %v413_v52  ;;  %v734_v58 = vpop.f32.mrb[11].mxu1 }
 0x15a   : > { %502 = vst.msk [vmem:[%s1234_s23 + $0x10] sm:$0xf] %vm497_vm3, %v676_v53  ;;  %v677_v59 = vpack.c.bf16 %v374_v54, %v374_v54  ;;  %512 = vst.msk [vmem:[%s1234_s23 + $0x38] sm:$0xf] %vm497_vm3, %v686_v56  ;;  %v687_v60 = vpack.c.bf16 %v414_v57, %v414_v57 }
 0x15c   : > { %503 = vst.msk [vmem:[%s1234_s23 + $0x14] sm:$0xf] %vm497_vm3, %v677_v59  ;;  %513 = vst.msk [vmem:[%s1234_s23 + $0x3c] sm:$0xf] %vm497_vm3, %v687_v60 }
 0x15d   : > { %v378_v61 = vpop.f32.mrb[12].mxu0  ;;  %v418_v62 = vpop.f32.mrb[12].mxu1 }
 0x15e   : > { %v379_v63 = vadd.f32 %v1226_v12, %v378_v61  ;;  %v717_v0 = vpop.f32.mrb[13].mxu0  ;;  %v419_v1 = vadd.f32 %v1226_v12, %v418_v62  ;;  %v737_v2 = vpop.f32.mrb[13].mxu1 }
 0x15f   : > { %v381_v3 = vpop.f32.mrb[14].mxu0  ;;  %v421_v4 = vpop.f32.mrb[14].mxu1 }
 0x160   : > { %v678_v5 = vpack.c.bf16 %v379_v63, %v379_v63  ;;  %v382_v6 = vadd.f32 %v1226_v12, %v381_v3  ;;  %v718_v7 = vpop.f32.mrb[15].mxu0  ;;  %v688_v8 = vpack.c.bf16 %v419_v1, %v419_v1  ;;  %v422_v9 = vadd.f32 %v1226_v12, %v421_v4  ;;  %v738_v10 = vpop.f32.mrb[15].mxu1 }
 0x162   : > { %504 = vst.msk [vmem:[%s1234_s23 + $0x18] sm:$0xf] %vm497_vm3, %v678_v5  ;;  %v679_v11 = vpack.c.bf16 %v382_v6, %v382_v6  ;;  %514 = vst.msk [vmem:[%s1234_s23 + $0x40] sm:$0xf] %vm497_vm3, %v688_v8  ;;  %v689_v13 = vpack.c.bf16 %v422_v9, %v422_v9 }
 0x164   : > { %505 = vst.msk [vmem:[%s1234_s23 + $0x1c] sm:$0xf] %vm497_vm3, %v679_v11  ;;  %515 = vst.msk [vmem:[%s1234_s23 + $0x44] sm:$0xf] %vm497_vm3, %v689_v13 }
 0x165   : > { %v386_v14 = vpop.f32.mrb[16].mxu0 }
 0x166   : > { %v387_v15 = vadd.f32 %v1226_v12, %v386_v14  ;;  %v721_v16 = vpop.f32.mrb[17].mxu0 }
 0x167   : > { %v389_v17 = vpop.f32.mrb[18].mxu0 }
 0x168   : > { %v680_v18 = vpack.c.bf16 %v387_v15, %v387_v15  ;;  %v390_v19 = vadd.f32 %v1226_v12, %v389_v17  ;;  %v722_v20 = vpop.f32.mrb[19].mxu0 }
 0x16a   : > { %506 = vst.msk [vmem:[%s1234_s23 + $0x20] sm:$0xf] %vm497_vm3, %v680_v18  ;;  %v681_v21 = vpack.c.bf16 %v390_v19, %v390_v19 }
 0x16c   : > { %507 = vst.msk [vmem:[%s1234_s23 + $0x24] sm:$0xf] %vm497_vm3, %v681_v21 }
 0x16d   : > { %924 = shalt.err (!%p921_p6)
}
 0x16e   : > { %s925_s4 = scalar_lea.hbm %s1287_s10, 1152  ;;  %s929_s29 = scalar_lea.hbm %s1340_s3, 2304 }
 0x16f   : > { %p926_p12 = scmp.ne.s32.totalorder %s1287_s10, %s925_s4  ;;  %p930_p11 = scmp.lt.u32.totalorder %s1287_s10, %s1340_s3 }
 0x170   : > { %p931_p7 = scmp.lt.u32.totalorder %s929_s29, %s925_s4  ;;  %p933_p8 = scmp.lt.u32.totalorder %s925_s4, %s1287_s10 }
 0x171   : > { %p927_p13 = pnand %p926_p12, %p1359_p4 }
 0x172   : > { %p932_p3 = por %p931_p7, %p930_p11 }
 0x173   : > { %p928_p1 = pneg %p927_p13 }
 0x174   : > { %p934_p5 = por %p933_p8, %p932_p3 }
 0x176   : > { %p935_p10 = pnand %p934_p5, %p928_p1 }
 0x178   : > { %938 = shalt.err (!%p935_p10)
}
 0x179   : > { %s991_s17 = smov 64   ;;  %s992_s23 = smov 4  }
 0x17a   : > { %753 = dma.vmem_to_hbm [thread:$0]  (%p1359_p4), %s1289_s30, 1152, %s1287_s10, %s517_s16, %s991_s17, %s991_s17, %s992_s23  }
 0x17b PF: > { %s545_s26 = sand.u32 1, %s969_s12   ;;  %p1360_p2 = scmp.ne.s32.totalorder %s1349_s25, 0 }
 0x17c   : > { %p1361_p0 = scmp.ge.s32.totalorder %s981_s15, 2  ;;  %s546_s8 = scalar_lea.sflag [#allocation4], %s545_s26 }
 0x17e   : > { %p767_p9 = pnand %p1361_p0, %p1360_p2 }
 0x180   : > { %964 = dma.done.wait (!%p767_p9), %s546_s8, 1152  }
 0x181   : > { %966 = vsyncadd (!%p767_p9), %s546_s8, 4294966144  ;;  %p17_p6 = scmp.ge.s32.totalorder %s1038_s18, 4   ;;  %s1362_s12 = smov %s973_s13 }
 0x182   : > { %s1363_s13 = smov %s977_s14  ;;  %s1364_s14 = smov %s1050_s21 }
 0x183   : > { %s1365_s15 = smov %s1038_s18  ;;  %19 = sbr.rel (!%p17_p6) target bundleno = 6 (0x6), region = 85 }
 0x18a   :  { %551 = vsyncpa [#allocation3], 1 }
 0x18b   :  { %553 = vsyncpa [#allocation3 + $0x1], 1 }
 0x18c   :  { %554 = vsyncpa [#allocation6], 1 }
 0x18d   :  { %555 = vsyncpa [#allocation4], 1 }
 0x18e   :  { %557 = vsyncpa [#allocation4 + $0x1], 1 }

</bundles_post_ra>
